<compile_context>
chip_gen: v5e
topology: v5e:2x2
jax: 0.10.0
libtpu: 0.0.40
codegen_flags: <defaults>
</compile_context>

<pallas_src>
import jax
import jax.numpy as jnp
from jax.experimental import pallas as pl
from jax.experimental.pallas import tpu as pltpu


def _ffwd_kernel(x_ref, w1_ref, b1_ref, w2_ref, b2_ref, o_ref, acc_ref):
    # x_ref : (tm, C)  token tile (resident across the hidden axis)
    # w1_ref: (C, th)  slice of first weight
    # b1_ref: (1, th)  f32 slice of first bias
    # w2_ref: (th, C)  slice of second weight
    # b2_ref: (1, C)   f32 second bias
    # o_ref : (tm, C)  output tile (written on last hidden step)
    # acc_ref:(tm, C)  f32 accumulator scratch
    h_idx = pl.program_id(1)

    @pl.when(h_idx == 0)
    def _():
        acc_ref[...] = jnp.zeros_like(acc_ref)

    # Linear 1 (this hidden tile) + bias + ReLU, in f32. Only a (tm, th) value is live.
    h = jnp.dot(x_ref[...], w1_ref[...], preferred_element_type=jnp.float32)
    h = jnp.maximum(h + b1_ref[...], 0.0)

    # Linear 2 partial product over this hidden tile, accumulated in f32.
    acc_ref[...] += jnp.dot(h.astype(w2_ref.dtype), w2_ref[...],
                            preferred_element_type=jnp.float32)

    @pl.when(h_idx == pl.num_programs(1) - 1)
    def _():
        # TODO(synk): dropout omitted (inference mode); for training build the mask here with
        # pltpu.prng_seed + pltpu.prng_random_bits.
        o_ref[...] = (acc_ref[...] + b2_ref[...]).astype(o_ref.dtype)


def feed_forward(x, w1, b1, w2, b2, *, tile_m=256, tile_h=1024,
                 compute_dtype=jnp.bfloat16):
    """x: (B, T, C) -> (B, T, C). Fused Linear -> ReLU -> Linear (dropout = identity)."""
    B, T, C = x.shape
    H = w1.shape[1]
    M = B * T

    x2d = x.reshape(M, C).astype(compute_dtype)
    w1c = w1.astype(compute_dtype)
    w2c = w2.astype(compute_dtype)
    b1f = b1.reshape(1, H).astype(jnp.float32)
    b2f = b2.reshape(1, C).astype(jnp.float32)

    # Token tile: multiple of 8 sublanes; Pallas masks the partial last block's writeback.
    tm = min(tile_m, pl.cdiv(M, 8) * 8)

    # Hidden tile must evenly divide H (reduction axis of the second matmul; a ragged tail
    # would pollute the accumulator).
    if H % 128 == 0:
        th = max(128, (min(tile_h, H) // 128) * 128)
        while H % th != 0:
            th -= 128
    else:
        th = H  # toy / unaligned configs: single hidden tile

    grid = (pl.cdiv(M, tm), H // th)

    itemsize = lambda a: jnp.dtype(a.dtype).itemsize
    flops = 4 * M * C * H  # two matmuls, 2*M*C*H each
    bytes_accessed = (
        x2d.size * itemsize(x2d) + M * C * itemsize(x)       # read x, write y
        + w1c.size * itemsize(w1c) + w2c.size * itemsize(w2c)
        + b1f.size * 4 + b2f.size * 4)

    out = pl.pallas_call(
        _ffwd_kernel,
        out_shape=jax.ShapeDtypeStruct((M, C), x.dtype),
        grid_spec=pltpu.PrefetchScalarGridSpec(
            num_scalar_prefetch=0,
            grid=grid,
            in_specs=[
                pl.BlockSpec((tm, C), lambda i, h: (i, 0)),   # x tokens (resident over h)
                pl.BlockSpec((C, th), lambda i, h: (0, h)),   # W1 hidden slice
                pl.BlockSpec((1, th), lambda i, h: (0, h)),   # b1 hidden slice
                pl.BlockSpec((th, C), lambda i, h: (h, 0)),   # W2 hidden slice
                pl.BlockSpec((1, C), lambda i, h: (0, 0)),    # b2 (resident)
            ],
            out_specs=pl.BlockSpec((tm, C), lambda i, h: (i, 0)),
            scratch_shapes=[pltpu.VMEM((tm, C), jnp.float32)],
        ),
        compiler_params=pltpu.CompilerParams(
            dimension_semantics=("parallel", "arbitrary"),
            vmem_limit_bytes=48 * 1024 * 1024,   # comfortably inside v7x's 64 MiB physical VMEM
        ),
        cost_estimate=pl.CostEstimate(
            flops=flops, transcendentals=0, bytes_accessed=bytes_accessed),
    )(x2d, w1c, b1f, w2c, b2f)

    return out.reshape(B, T, C)


def init_params(key, n_embd, dtype=jnp.float32):
    """Deterministic init mimicking nn.Linear's U(-1/sqrt(fan_in), 1/sqrt(fan_in))."""
    h = 4 * n_embd
    k1, k2, k3, k4 = jax.random.split(key, 4)
    bound1 = 1.0 / (n_embd ** 0.5)
    bound2 = 1.0 / (h ** 0.5)
    w1 = jax.random.uniform(k1, (n_embd, h), dtype, -bound1, bound1)
    b1 = jax.random.uniform(k2, (1, h), dtype, -bound1, bound1)
    w2 = jax.random.uniform(k3, (h, n_embd), dtype, -bound2, bound2)
    b2 = jax.random.uniform(k4, (1, n_embd), dtype, -bound2, bound2)
    return w1, b1, w2, b2


if __name__ == "__main__":
    key = jax.random.PRNGKey(0)
    B, T, n_embd = 2, 8, 32          # small GPT-ish shapes
    dropout = 0.1                    # unused at inference (identity)

    kx, kp = jax.random.split(key)
    x = jax.random.normal(kx, (B, T, n_embd), jnp.float32)
    w1, b1, w2, b2 = init_params(kp, n_embd)

    # Pure-JAX f32 reference.
    ref = jnp.maximum(x.reshape(-1, n_embd) @ w1 + b1, 0.0) @ w2 + b2
    ref = ref.reshape(B, T, n_embd)

    # 1) Exact-path check: f32 compute inside the kernel, tight tolerance.
    y32 = jax.block_until_ready(
        feed_forward(x, w1, b1, w2, b2, compute_dtype=jnp.float32))
    assert y32.shape == ref.shape and y32.dtype == ref.dtype
    assert jnp.allclose(y32, ref, atol=1e-5, rtol=1e-5), "f32 kernel mismatch vs reference"

    # 2) Production path: bf16 compute with f32 accumulation, loose tolerance.
    y = jax.block_until_ready(feed_forward(x, w1, b1, w2, b2))
    assert y.shape == ref.shape and y.dtype == ref.dtype
    assert jnp.allclose(y, ref, atol=5e-2, rtol=5e-2), "bf16 kernel mismatch vs reference"

    print("KERNEL_OK")
</pallas_src>

<mosaic_0001>
module attributes {stable_mosaic.version = 11 : i64} {
  func.func @_ffwd_kernel(%arg0: i32, %arg1: i32, %arg2: memref<16x32xf32, #tpu.memory_space<vmem>>, %arg3: memref<32x128xf32, #tpu.memory_space<vmem>>, %arg4: memref<1x128xf32, #tpu.memory_space<vmem>>, %arg5: memref<128x32xf32, #tpu.memory_space<vmem>>, %arg6: memref<1x32xf32, #tpu.memory_space<vmem>>, %arg7: memref<16x32xf32, #tpu.memory_space<vmem>>, %arg8: memref<16x32xf32, #tpu.memory_space<vmem>>) attributes {dimension_semantics = [#tpu.dimension_semantics<parallel>, #tpu.dimension_semantics<arbitrary>], iteration_bounds = array<i64: 1, 1>, scalar_prefetch = 0 : i64, scratch_operands = 1 : i64, tpu.core_type = #tpu.core_type<tc>, window_params = [{transform_indices = @transform_0, window_bounds = array<i64: 16, 32>}, {transform_indices = @transform_1, window_bounds = array<i64: 32, 128>}, {transform_indices = @transform_2, window_bounds = array<i64: 1, 128>}, {transform_indices = @transform_3, window_bounds = array<i64: 128, 32>}, {pipeline_mode = #tpu.pipeline_mode<synchronous>, transform_indices = @transform_4, window_bounds = array<i64: 1, 32>}, {transform_indices = @transform_5, window_bounds = array<i64: 16, 32>}]} {
    %c0_i32 = arith.constant 0 : i32
    %0 = arith.cmpi eq, %arg1, %c0_i32 : i32
    %1 = arith.extui %0 : i1 to i32
    %c0_i32_0 = arith.constant 0 : i32
    %2 = arith.cmpi ne, %1, %c0_i32_0 : i32
    scf.if %2 {
      %cst_16 = arith.constant 0.000000e+00 : f32
      %19 = vector.broadcast %cst_16 : f32 to vector<16x32xf32>
      %c0_17 = arith.constant 0 : index
      %c0_18 = arith.constant 0 : index
      %20 = vector.load %arg8[%c0_17, %c0_18] : memref<16x32xf32, #tpu.memory_space<vmem>>, vector<16x32xf32>
      tpu.vector_store %arg8[%c0_17, %c0_18], %19 {strides = array<i32>} : memref<16x32xf32, #tpu.memory_space<vmem>>, vector<16x32xf32>,
    } else {
    }
    %c0 = arith.constant 0 : index
    %c0_1 = arith.constant 0 : index
    %3 = vector.load %arg2[%c0, %c0_1] : memref<16x32xf32, #tpu.memory_space<vmem>>, vector<16x32xf32>
    %c0_2 = arith.constant 0 : index
    %c0_3 = arith.constant 0 : index
    %4 = vector.load %arg3[%c0_2, %c0_3] : memref<32x128xf32, #tpu.memory_space<vmem>>, vector<32x128xf32>
    %cst = arith.constant dense<0.000000e+00> : vector<16x128xf32>
    %5 = tpu.matmul %3, %4, %cst {dimension_numbers = #tpu.dot_dimension_numbers<[1], [0], [0], [1], [0, 0, 1, 1], [], []>} : vector<16x32xf32>, vector<32x128xf32>, vector<16x128xf32> -> vector<16x128xf32>
    %c0_4 = arith.constant 0 : index
    %c0_5 = arith.constant 0 : index
    %6 = vector.load %arg4[%c0_4, %c0_5] : memref<1x128xf32, #tpu.memory_space<vmem>>, vector<1x128xf32>
    %7 = vector.broadcast %6 : vector<1x128xf32> to vector<16x128xf32>
    %8 = arith.addf %5, %7 : vector<16x128xf32>
    %cst_6 = arith.constant 0.000000e+00 : f32
    %9 = vector.broadcast %cst_6 : f32 to vector<16x128xf32>
    %10 = arith.maximumf %8, %9 : vector<16x128xf32>
    %c0_7 = arith.constant 0 : index
    %c0_8 = arith.constant 0 : index
    %11 = vector.load %arg8[%c0_7, %c0_8] : memref<16x32xf32, #tpu.memory_space<vmem>>, vector<16x32xf32>
    %c0_9 = arith.constant 0 : index
    %c0_10 = arith.constant 0 : index
    %12 = vector.load %arg5[%c0_9, %c0_10] : memref<128x32xf32, #tpu.memory_space<vmem>>, vector<128x32xf32>
    %cst_11 = arith.constant dense<0.000000e+00> : vector<16x32xf32>
    %13 = tpu.matmul %10, %12, %cst_11 {dimension_numbers = #tpu.dot_dimension_numbers<[1], [0], [0], [1], [0, 0, 1, 1], [], []>} : vector<16x128xf32>, vector<128x32xf32>, vector<16x32xf32> -> vector<16x32xf32>
    %14 = arith.addf %11, %13 : vector<16x32xf32>
    %c0_12 = arith.constant 0 : index
    %c0_13 = arith.constant 0 : index
    %15 = vector.load %arg8[%c0_12, %c0_13] : memref<16x32xf32, #tpu.memory_space<vmem>>, vector<16x32xf32>
    tpu.vector_store %arg8[%c0_12, %c0_13], %14 {strides = array<i32>} : memref<16x32xf32, #tpu.memory_space<vmem>>, vector<16x32xf32>,
    %c0_i32_14 = arith.constant 0 : i32
    %16 = arith.cmpi eq, %arg1, %c0_i32_14 : i32
    %17 = arith.extui %16 : i1 to i32
    %c0_i32_15 = arith.constant 0 : i32
    %18 = arith.cmpi ne, %17, %c0_i32_15 : i32
    scf.if %18 {
      %c0_16 = arith.constant 0 : index
      %c0_17 = arith.constant 0 : index
      %19 = vector.load %arg8[%c0_16, %c0_17] : memref<16x32xf32, #tpu.memory_space<vmem>>, vector<16x32xf32>
      %c0_18 = arith.constant 0 : index
      %c0_19 = arith.constant 0 : index
      %20 = vector.load %arg6[%c0_18, %c0_19] : memref<1x32xf32, #tpu.memory_space<vmem>>, vector<1x32xf32>
      %21 = vector.broadcast %20 : vector<1x32xf32> to vector<16x32xf32>
      %22 = arith.addf %19, %21 : vector<16x32xf32>
      %c0_20 = arith.constant 0 : index
      %c0_21 = arith.constant 0 : index
      %23 = vector.load %arg7[%c0_20, %c0_21] : memref<16x32xf32, #tpu.memory_space<vmem>>, vector<16x32xf32>
      tpu.vector_store %arg7[%c0_20, %c0_21], %22 {strides = array<i32>} : memref<16x32xf32, #tpu.memory_space<vmem>>, vector<16x32xf32>,
    } else {
    }
    return
  }
  func.func @transform_0(%arg0: i32, %arg1: i32) -> (i32, i32) {
    %c0_i32 = arith.constant 0 : i32
    %c0_i32_0 = arith.constant 0 : i32
    return %arg0, %c0_i32 : i32, i32
  }
  func.func @transform_1(%arg0: i32, %arg1: i32) -> (i32, i32) {
    %c0_i32 = arith.constant 0 : i32
    %c0_i32_0 = arith.constant 0 : i32
    return %c0_i32, %arg1 : i32, i32
  }
  func.func @transform_2(%arg0: i32, %arg1: i32) -> (i32, i32) {
    %c0_i32 = arith.constant 0 : i32
    %c0_i32_0 = arith.constant 0 : i32
    return %c0_i32, %arg1 : i32, i32
  }
  func.func @transform_3(%arg0: i32, %arg1: i32) -> (i32, i32) {
    %c0_i32 = arith.constant 0 : i32
    %c0_i32_0 = arith.constant 0 : i32
    return %arg1, %c0_i32 : i32, i32
  }
  func.func @transform_4(%arg0: i32, %arg1: i32) -> (i32, i32) {
    %c0_i32 = arith.constant 0 : i32
    %c0_i32_0 = arith.constant 0 : i32
    %c0_i32_1 = arith.constant 0 : i32
    return %c0_i32, %c0_i32_0 : i32, i32
  }
  func.func @transform_5(%arg0: i32, %arg1: i32) -> (i32, i32) {
    %c0_i32 = arith.constant 0 : i32
    %c0_i32_0 = arith.constant 0 : i32
    return %arg0, %c0_i32 : i32, i32
  }
}

</mosaic_0001>

<bundles_post_ra>
// kernel: tpu_custom_call.1
= control target key start
LH: loop header
LB: loop body
LE: loop exit
PB: predicated region body
PF: predicated region fallthrough
CT: control target
= control target key end

     0   :  { %vm25_vm0 = vcmask 261120   ;;  %s313_s0 = inlined_call_operand.vmem [shape: f32[16,32], index: 0, kind: input, shape index: {}]   ;;  %s314_s1 = inlined_call_operand.vmem [shape: f32[32,128], index: 1, kind: input, shape index: {}]   ;;  %s315_s2 = inlined_call_operand.vmem [shape: f32[1,128], index: 2, kind: input, shape index: {}]   ;;  %s316_s3 = inlined_call_operand.vmem [shape: f32[128,32], index: 3, kind: input, shape index: {}]   ;;  %s317_s4 = inlined_call_operand.vmem [shape: f32[1,32], index: 4, kind: input, shape index: {}]   ;;  %s318_s5 = inlined_call_operand.hbm [shape: f32[16,32], index: 5, kind: output, shape index: {}]  }
   0x1   :  { %v33_v0 = vld [vmem:[%s314_s1 + $0x18] sm:$0xff]  ;;  %v32_v1 = vld [vmem:[%s314_s1 + $0x10] sm:$0xff]  ;;  %v31_v2 = vld [vmem:[%s314_s1 + $0x8] sm:$0xff] }
   0x2   :  { %57 = vmatpush.msra.mxu0 %v33_v0  ;;  %v87_v3 = vld [vmem:[%s316_s3 + $0x78] sm:$0xff]  ;;  %v86_v4 = vld [vmem:[%s316_s3 + $0x70] sm:$0xff]  ;;  %v30_v5 = vld [vmem:[%s314_s1] sm:$0xff] }
   0x3   :  { %88 = vmatpush.msra.mxu1 %v87_v3  ;;  %v85_v6 = vld [vmem:[%s316_s3 + $0x68] sm:$0xff]  ;;  %148 = vmatpush.msra.mxu2 %v87_v3  ;;  %v28_v7 = vld [vmem:[%s313_s0] sm:$0xff] }
   0x4   :  { %58 = vmatpush.msra.mxu0 %v32_v1  ;;  %v84_v8 = vld [vmem:[%s316_s3 + $0x60] sm:$0xff] }
   0x5   :  { %89 = vmatpush.msra.mxu1 %v86_v4  ;;  %149 = vmatpush.msra.mxu2 %v86_v4 }
   0x6   :  { %59 = vmatpush.msra.mxu0 %v31_v2 }
   0x7   :  { %90 = vmatpush.msra.mxu1 %v85_v6 }
   0x8   :  { %60 = vmatpush.msra.mxu0 %v30_v5 }
   0x9   :  { %10 = vsyncpa [#allocation4], 0  ;;  %146 = vmatmul.msk.f32.vlgmr.msra.gmra.mxu0 %vm25_vm0, %v28_v7  ;;  %v83_v9 = vld [vmem:[%s316_s3 + $0x58] sm:$0xff]  ;;  %150 = vmatpush.msra.mxu2 %v85_v6  ;;  %v82_v10 = vld [vmem:[%s316_s3 + $0x50] sm:$0xff]  ;;  %v196_v22 = vmov 0.0   ;;  %s134_s15 = sshll.u32 %s318_s5, 4  ;;  %s135_s15 = int_to_ptr.hbm [resolvable:$true] %s134_s15 }
   0xa   :  { %91 = vmatpush.msra.mxu1 %v84_v8  ;;  %v81_v11 = vld [vmem:[%s316_s3 + $0x48] sm:$0xff]  ;;  %v80_v13 = vld [vmem:[%s316_s3 + $0x40] sm:$0xff]  ;;  %v79_v14 = vld [vmem:[%s316_s3 + $0x38] sm:$0xff]  ;;  %26 = vst.msk [vmem:[#allocation2] sm:$0xff] %vm25_vm0, %v196_v22  ;;  %s199_s16 = smov 8  }
   0xb   :  { %151 = vmatpush.msra.mxu2 %v84_v8  ;;  %v29_v12 = vld [vmem:[%s313_s0 + $0x8] sm:$0xff]  ;;  %v78_v15 = vld [vmem:[%s316_s3 + $0x30] sm:$0xff]  ;;  %v76_v17 = vld [vmem:[%s316_s3 + $0x20] sm:$0xff]  ;;  %27 = vst.msk [vmem:[#allocation2 + $0x8] sm:$0xff] %vm25_vm0, %v196_v22 }
   0xc   :  { %92 = vmatpush.msra.mxu1 %v83_v9  ;;  %v77_v16 = vld [vmem:[%s316_s3 + $0x28] sm:$0xff]  ;;  %v75_v18 = vld [vmem:[%s316_s3 + $0x18] sm:$0xff]  ;;  %v74_v19 = vld [vmem:[%s316_s3 + $0x10] sm:$0xff] }
   0xd   :  { %152 = vmatpush.msra.mxu2 %v83_v9  ;;  %v73_v20 = vld [vmem:[%s316_s3 + $0x8] sm:$0xff]  ;;  %v72_v21 = vld [vmem:[%s316_s3] sm:$0xff] }
   0xe   :  { %93 = vmatpush.msra.mxu1 %v82_v10  ;;  %v168_v23 = vld [vmem:[%s315_s2] ss:$0 sm:$0xff]  ;;  %s197_s2 = smov [#allocation3]  }
   0xf   :  { %153 = vmatpush.msra.mxu2 %v82_v10  ;;  %v169_v33 = vld [vmem:[%s317_s4] ss:$0 sm:$0xff]  ;;  %s132_s12 = sshll.u32 %s197_s2, 4  ;;  %s198_s4 = smov 128   ;;  %s133_s12 = int_to_ptr.vmem [resolvable:$true] %s132_s12 }
  0x10   :  { %94 = vmatpush.msra.mxu1 %v81_v11 }
  0x11   :  { %147 = vmatmul.msk.f32.gmra.mxu0 %vm25_vm0, %v29_v12  ;;  %154 = vmatpush.msra.mxu2 %v81_v11  ;;  %v70_v30 = vld [vmem:[#allocation2] sm:$0xff] }
  0x12   :  { %95 = vmatpush.msra.mxu1 %v80_v13  ;;  %v71_v36 = vld [vmem:[#allocation2 + $0x8] sm:$0xff] }
  0x13   :  { %155 = vmatpush.msra.mxu2 %v80_v13 }
  0x14   :  { %96 = vmatpush.msra.mxu1 %v79_v14 }
  0x15   :  { %156 = vmatpush.msra.mxu2 %v79_v14 }
  0x16   :  { %97 = vmatpush.msra.mxu1 %v78_v15 }
  0x17   :  { %157 = vmatpush.msra.mxu2 %v78_v15 }
  0x18   :  { %98 = vmatpush.msra.mxu1 %v77_v16 }
  0x19   :  { %158 = vmatpush.msra.mxu2 %v77_v16 }
  0x1a   :  { %99 = vmatpush.msra.mxu1 %v76_v17 }
  0x1b   :  { %159 = vmatpush.msra.mxu2 %v76_v17 }
  0x1c   :  { %100 = vmatpush.msra.mxu1 %v75_v18 }
  0x1d   :  { %160 = vmatpush.msra.mxu2 %v75_v18 }
  0x1e   :  { %101 = vmatpush.msra.mxu1 %v74_v19 }
  0x1f   :  { %161 = vmatpush.msra.mxu2 %v74_v19 }
  0x20   :  { %102 = vmatpush.msra.mxu1 %v73_v20 }
  0x21   :  { %162 = vmatpush.msra.mxu2 %v73_v20 }
  0x22   :  { %103 = vmatpush.msra.mxu1 %v72_v21 }
  0x23   :  { %163 = vmatpush.msra.mxu2 %v72_v21 }
  0x86   :  { %v62_v24 = vpop.f32.mrf.mxu0 }
  0x87   :  { %v63_v25 = vadd.f32 %v168_v23, %v62_v24 }
  0x89   :  { %v68_v26 = vmax.f32 %v63_v25, 0.0 }
  0x8b   :  { %104 = vmatmul.f32.vlgmr.msra.gmra.mxu1 %v68_v26 }
  0x8e   :  { %v65_v27 = vpop.f32.mrf.mxu0 }
  0x8f   :  { %v66_v28 = vadd.f32 %v168_v23, %v65_v27 }
  0x91   :  { %v69_v29 = vmax.f32 %v66_v28, 0.0 }
  0x93   :  { %107 = vmatmul.f32.vlgmr.msra.gmra.mxu2 %v69_v29 }
 0x108   :  { %v105_v31 = vpop.f32.mrf.mxu1 }
 0x109   :  { %v111_v32 = vadd.f32 %v105_v31, %v70_v30 }
 0x10b   :  { %113 = vst.msk [vmem:[#allocation2] sm:$0xff] %vm25_vm0, %v111_v32 }
 0x112   :  { %v118_v34 = vld [vmem:[#allocation2] sm:$0xff] }
 0x113   :  { %v124_v35 = vadd.f32 %v169_v33, %v118_v34 }
 0x115   :  { %126 = vst.msk [vmem:[#allocation3] sm:$0xff] %vm25_vm0, %v124_v35 }
 0x116   :  { %v108_v37 = vpop.f32.mrf.mxu2 }
 0x117   :  { %v112_v38 = vadd.f32 %v108_v37, %v71_v36 }
 0x119   :  { %114 = vst.msk [vmem:[#allocation2 + $0x8] sm:$0xff] %vm25_vm0, %v112_v38 }
 0x120   :  { %v119_v39 = vld [vmem:[#allocation2 + $0x8] sm:$0xff] }
 0x121   :  { %v125_v40 = vadd.f32 %v169_v33, %v119_v39 }
 0x123   :  { %127 = vst.msk [vmem:[#allocation3 + $0x8] sm:$0xff] %vm25_vm0, %v125_v40 }
 0x124   :  { %140 = dma.vmem_to_hbm [thread:$0]  %s133_s12, 256, %s135_s15, [#allocation4], %s198_s4, %s198_s4, %s199_s16  }
 0x125   :  { %194 = dma.done.wait [#allocation4], 256  }
 0x126   :  { %195 = vsyncadd [#allocation4], 4294967040 }
 0x127   :  { %145 = vsyncpa [#allocation4], 1 }

</bundles_post_ra>
